<compile_context>
chip_gen: v7x
topology: tpu7x:2x2x1
jax: 0.10.0
libtpu: 0.0.40
codegen_flags: <defaults>
</compile_context>

<pallas_src>
import functools

import jax
import jax.numpy as jnp
from jax.experimental import pallas as pl
from jax.experimental.pallas import tpu as pltpu


def _round_up(a, m):
    return (a + m - 1) // m * m


def _choose_lane_tile(p_out, per_lane_bytes, fixed_bytes, budget_bytes):
    """Largest 128-multiple divisor of p_out keeping per-step VMEM under budget."""
    n128 = p_out // 128
    best = 128
    for t in range(1, n128 + 1):
        if n128 % t == 0 and fixed_bytes + 128 * t * per_lane_bytes <= budget_bytes:
            best = 128 * t
    return best


# ---------------------------------------------------------------------------
# Pallas kernel: fused direct conv (stacked taps -> one matmul) + ReLU
# ---------------------------------------------------------------------------
def _conv_stacked_kernel(xp_ref, w_ref, o_ref, xs_ref, *,
                         k, c_in_pad, wp, p_tile, n_ptiles):
    """One (batch, lane-tile) grid step.

    xp_ref: (C_in_pad, P_in)  bf16  zero-padded image, spatial flattened on the
                              lane axis (p = h*Wp + w); channel C_in is all
                              ones (fused-bias channel), trailing pad chans 0.
    w_ref : (C_out, K)        bf16  K = k*k*C_in_pad; column d*C_in_pad + ci is
                              weight[:, ci, dh, dw]; the ones-channel column of
                              tap 0 holds the bias.
    o_ref : (C_out, p_tile)   f32   lane-dense (128-multiple) output tile.
    xs_ref: (K, p_tile)       bf16  VMEM staging: k*k shifted windows stacked
                              along the contraction (sublane) axis.
    """
    if n_ptiles == 1:
        base = 0                                           # static path (demo)
    else:
        base = pl.multiple_of(pl.program_id(1) * p_tile, 128)

    # Build the stacked-tap RHS once; the window shifts are folded into this
    # staging copy (no per-tap operand materialization feeding separate
    # matmuls).  Each piece lands at a 16-row-aligned sublane offset.
    for d in range(k * k):
        off = (d // k) * wp + (d % k)                      # static tap offset
        if n_ptiles == 1:
            win = xp_ref[:, off:off + p_tile]
        else:
            win = xp_ref[:, pl.ds(base + off, p_tile)]
        xs_ref[d * c_in_pad:(d + 1) * c_in_pad, :] = win

    # Single MXU matmul with K = k*k*C_in_pad; f32 accumulation.  The bias is
    # produced by the ones channel, so no separate bias VPU pass is needed.
    acc = jnp.dot(w_ref[...], xs_ref[...], preferred_element_type=jnp.float32)
    o_ref[...] = jnp.maximum(acc, 0.0).astype(o_ref.dtype)          # ReLU


# ---------------------------------------------------------------------------
# Wrapper: pad -> flatten spatial into lanes -> kernel -> crop/subsample
# ---------------------------------------------------------------------------
@functools.partial(jax.jit, static_argnames=("kernel_size", "stride", "padding"))
def conv2d_block(x, weight, bias, *, kernel_size, stride, padding=0):
    """Conv2dBlock forward: zero-pad -> conv (with bias) -> ReLU.

    x:      (N, C_in, H, W)   float32, NCHW
    weight: (C_out, C_in, kH, kW)
    bias:   (C_out,)
    returns (N, C_out, H_out, W_out) float32
    """
    N, C_in, H, W = x.shape
    C_out = weight.shape[0]
    k, s, p = kernel_size, stride, padding
    k2 = k * k

    Hp, Wp = H + 2 * p, W + 2 * p
    Ho = (Hp - k) // s + 1
    Wo = (Wp - k) // s + 1

    # +1 ones channel (fused bias), padded to the bf16 sublane tile (16) so the
    # stacked-tap staging writes are tile-aligned.  Negligible at real channel
    # counts; trivial bytes at demo size.
    C_in_pad = _round_up(C_in + 1, 16)
    K = k2 * C_in_pad

    # Only compute the stride-1 rows the strided output actually samples.
    H_keep = (Ho - 1) * s + 1
    P_keep = H_keep * Wp
    P_out = _round_up(P_keep, 128)                  # lane-dense output width
    max_off = (k - 1) * Wp + (k - 1)                # largest tap offset read
    P_in = P_out + _round_up(max_off, 128)          # keeps every window in bounds
    P_valid = Hp * Wp

    # Lane-tile P_out (second, parallel grid axis) under a per-step VMEM
    # budget; the resident padded image + weights are the fixed terms, the
    # staging scratch + double-buffered output tile scale with the tile.
    per_lane_bytes = K * 2 + 2 * C_out * 4
    fixed_bytes = 2 * C_in_pad * P_in * 2 + 2 * C_out * K * 2
    P_tile = _choose_lane_tile(P_out, per_lane_bytes, fixed_bytes,
                               budget_bytes=12 * 1024 * 1024)
    n_ptiles = P_out // P_tile

    # --- input prep: ZeroPad2d + ones channel + flatten, single bf16 pass ---
    xsp = jnp.pad(x, ((0, 0), (0, 0), (p, p), (p, p)))
    xsp = xsp.reshape(N, C_in, P_valid).astype(jnp.bfloat16)
    parts = [xsp, jnp.ones((N, 1, P_valid), jnp.bfloat16)]
    if C_in_pad - C_in - 1:
        parts.append(jnp.zeros((N, C_in_pad - C_in - 1, P_valid), jnp.bfloat16))
    xp = jnp.concatenate(parts, axis=1)
    # Flat tail only has to exist (it feeds positions that get cropped away);
    # pad with zeros / crop to exactly P_in lanes.
    xp = jnp.pad(xp, ((0, 0), (0, 0), (0, max(P_in - P_valid, 0))))[:, :, :P_in]

    # --- weight prep: (C_out, C_in, kH, kW) -> (C_out, k*k*C_in_pad) with the
    # bias folded into the ones-channel column of tap 0 ----------------------
    w_taps = jnp.transpose(weight, (2, 3, 0, 1)).reshape(k2, C_out, C_in)
    w_pad = jnp.zeros((k2, C_out, C_in_pad), jnp.float32)
    w_pad = w_pad.at[:, :, :C_in].set(w_taps.astype(jnp.float32))
    w_pad = w_pad.at[0, :, C_in].set(bias.astype(jnp.float32))
    w_mat = jnp.transpose(w_pad, (1, 0, 2)).reshape(C_out, K).astype(jnp.bfloat16)

    kern = functools.partial(_conv_stacked_kernel, k=k, c_in_pad=C_in_pad,
                             wp=Wp, p_tile=P_tile, n_ptiles=n_ptiles)

    flops = 2 * N * C_out * K * P_out
    bytes_accessed = xp.size * 2 + w_mat.size * 2 + N * C_out * P_out * 4

    out_flat = pl.pallas_call(
        kern,
        out_shape=jax.ShapeDtypeStruct((N, C_out, P_out), jnp.float32),
        grid_spec=pltpu.PrefetchScalarGridSpec(
            num_scalar_prefetch=0,
            grid=(N, n_ptiles),
            in_specs=[
                # Whole padded image resident per batch element (index_map is
                # invariant across the lane-tile axis -> fetched once per n).
                pl.BlockSpec((None, C_in_pad, P_in), lambda n, j: (n, 0, 0)),
                # Weights resident across the whole grid.
                # TODO(synk): pipeline_mode=pl.Buffered(1) would reclaim the
                # redundant second buffer of this grid-invariant operand.
                pl.BlockSpec((C_out, K), lambda n, j: (0, 0)),
            ],
            out_specs=pl.BlockSpec((None, C_out, P_tile), lambda n, j: (n, 0, j)),
            scratch_shapes=[pltpu.VMEM((K, P_tile), jnp.bfloat16)],
        ),
        compiler_params=pltpu.CompilerParams(
            dimension_semantics=("parallel", "parallel"),
            vmem_limit_bytes=32 * 1024 * 1024,   # explicit; safe on v5e/v6e/v7x
        ),
        cost_estimate=pl.CostEstimate(
            flops=flops, transcendentals=0, bytes_accessed=bytes_accessed),
    )(xp, w_mat)

    # Crop the valid flat range and subsample rows/cols for the stride.  The
    # result is already channel-major (NCHW) -> no transpose pass.
    out_rows = out_flat[:, :, :P_keep].reshape(N, C_out, H_keep, Wp)
    return out_rows[:, :, ::s, :(Wo - 1) * s + 1:s]


# TODO(synk): only the default Conv2dBlock config (zero pad, norm='none',
# activation='relu') is implemented; reflect/replicate padding, batch/instance
# norm and the other activations are not exercised.  stride>1 still computes
# ~s^2 redundant stride-1 positions within the kept rows before subsampling.


if __name__ == "__main__":
    # Small shapes consistent with the module: N=2, C_in=4, H=W=16,
    # C_out=8, kernel_size=3, stride=1, padding=1 -> output (2, 8, 16, 16).
    key = jax.random.PRNGKey(0)
    kx, kw, kb = jax.random.split(key, 3)

    N, C_in, H, W = 2, 4, 16, 16
    C_out, ksz, stride, pad = 8, 3, 1, 1

    x = jax.random.normal(kx, (N, C_in, H, W), dtype=jnp.float32)
    fan_in = C_in * ksz * ksz
    bound = 1.0 / (fan_in ** 0.5)
    weight = jax.random.uniform(kw, (C_out, C_in, ksz, ksz),
                                minval=-bound, maxval=bound, dtype=jnp.float32)
    bias = jax.random.uniform(kb, (C_out,),
                              minval=-bound, maxval=bound, dtype=jnp.float32)

    out = conv2d_block(x, weight, bias,
                       kernel_size=ksz, stride=stride, padding=pad)
    out = jax.block_until_ready(out)

    # Reference with the same bf16 operand rounding the kernel uses
    # (f32 accumulation in both cases).
    xb = x.astype(jnp.bfloat16).astype(jnp.float32)
    wb = weight.astype(jnp.bfloat16).astype(jnp.float32)
    bb = bias.astype(jnp.bfloat16).astype(jnp.float32)
    ref = jax.lax.conv_general_dilated(
        xb, wb, window_strides=(stride, stride),
        padding=[(pad, pad), (pad, pad)],
        dimension_numbers=("NCHW", "OIHW", "NCHW"),
        precision=jax.lax.Precision.HIGHEST)
    ref = jnp.maximum(ref + bb[None, :, None, None], 0.0)

    assert out.shape == (N, C_out, H, W), out.shape
    err = jnp.max(jnp.abs(out - ref))
    assert jnp.allclose(out, ref, atol=1e-2, rtol=1e-2), (
        f"mismatch vs reference: max abs err {err}")

    print("KERNEL_OK")
</pallas_src>

<mosaic_0001>
module attributes {stable_mosaic.version = 11 : i64} {
  func.func @_conv_stacked_kernel(%arg0: i32, %arg1: i32, %arg2: memref<1x16x512xbf16, #tpu.memory_space<vmem>>, %arg3: memref<8x144xbf16, #tpu.memory_space<vmem>>, %arg4: memref<1x8x384xf32, #tpu.memory_space<vmem>>, %arg5: memref<144x384xbf16, #tpu.memory_space<vmem>>) attributes {dimension_semantics = [#tpu.dimension_semantics<parallel>, #tpu.dimension_semantics<parallel>], iteration_bounds = array<i64: 2, 1>, scalar_prefetch = 0 : i64, scratch_operands = 1 : i64, tpu.core_type = #tpu.core_type<tc>, window_params = [{transform_indices = @transform_0, window_bounds = array<i64: 1, 16, 512>}, {pipeline_mode = #tpu.pipeline_mode<synchronous>, transform_indices = @transform_1, window_bounds = array<i64: 8, 144>}, {transform_indices = @transform_2, window_bounds = array<i64: 1, 8, 384>}]} {
    %c0 = arith.constant 0 : index
    %c0_0 = arith.constant 0 : index
    %c0_1 = arith.constant 0 : index
    %0 = vector.load %arg2[%c0, %c0_0, %c0_1] : memref<1x16x512xbf16, #tpu.memory_space<vmem>>, vector<1x16x384xbf16>
    %1 = vector.shape_cast %0 : vector<1x16x384xbf16> to vector<16x384xbf16>
    %c0_2 = arith.constant 0 : index
    %c0_3 = arith.constant 0 : index
    %2 = vector.load %arg5[%c0_2, %c0_3] : memref<144x384xbf16, #tpu.memory_space<vmem>>, vector<16x384xbf16>
    tpu.vector_store %arg5[%c0_2, %c0_3], %1 {strides = array<i32>} : memref<144x384xbf16, #tpu.memory_space<vmem>>, vector<16x384xbf16>,
    %c0_4 = arith.constant 0 : index
    %c0_5 = arith.constant 0 : index
    %c1 = arith.constant 1 : index
    %3 = vector.load %arg2[%c0_4, %c0_5, %c1] : memref<1x16x512xbf16, #tpu.memory_space<vmem>>, vector<1x16x384xbf16>
    %4 = vector.shape_cast %3 : vector<1x16x384xbf16> to vector<16x384xbf16>
    %c16 = arith.constant 16 : index
    %c0_6 = arith.constant 0 : index
    %5 = vector.load %arg5[%c16, %c0_6] : memref<144x384xbf16, #tpu.memory_space<vmem>>, vector<16x384xbf16>
    tpu.vector_store %arg5[%c16, %c0_6], %4 {strides = array<i32>} : memref<144x384xbf16, #tpu.memory_space<vmem>>, vector<16x384xbf16>,
    %c0_7 = arith.constant 0 : index
    %c0_8 = arith.constant 0 : index
    %c2 = arith.constant 2 : index
    %6 = vector.load %arg2[%c0_7, %c0_8, %c2] : memref<1x16x512xbf16, #tpu.memory_space<vmem>>, vector<1x16x384xbf16>
    %7 = vector.shape_cast %6 : vector<1x16x384xbf16> to vector<16x384xbf16>
    %c32 = arith.constant 32 : index
    %c0_9 = arith.constant 0 : index
    %8 = vector.load %arg5[%c32, %c0_9] : memref<144x384xbf16, #tpu.memory_space<vmem>>, vector<16x384xbf16>
    tpu.vector_store %arg5[%c32, %c0_9], %7 {strides = array<i32>} : memref<144x384xbf16, #tpu.memory_space<vmem>>, vector<16x384xbf16>,
    %c0_10 = arith.constant 0 : index
    %c0_11 = arith.constant 0 : index
    %c18 = arith.constant 18 : index
    %9 = vector.load %arg2[%c0_10, %c0_11, %c18] : memref<1x16x512xbf16, #tpu.memory_space<vmem>>, vector<1x16x384xbf16>
    %10 = vector.shape_cast %9 : vector<1x16x384xbf16> to vector<16x384xbf16>
    %c48 = arith.constant 48 : index
    %c0_12 = arith.constant 0 : index
    %11 = vector.load %arg5[%c48, %c0_12] : memref<144x384xbf16, #tpu.memory_space<vmem>>, vector<16x384xbf16>
    tpu.vector_store %arg5[%c48, %c0_12], %10 {strides = array<i32>} : memref<144x384xbf16, #tpu.memory_space<vmem>>, vector<16x384xbf16>,
    %c0_13 = arith.constant 0 : index
    %c0_14 = arith.constant 0 : index
    %c19 = arith.constant 19 : index
    %12 = vector.load %arg2[%c0_13, %c0_14, %c19] : memref<1x16x512xbf16, #tpu.memory_space<vmem>>, vector<1x16x384xbf16>
    %13 = vector.shape_cast %12 : vector<1x16x384xbf16> to vector<16x384xbf16>
    %c64 = arith.constant 64 : index
    %c0_15 = arith.constant 0 : index
    %14 = vector.load %arg5[%c64, %c0_15] : memref<144x384xbf16, #tpu.memory_space<vmem>>, vector<16x384xbf16>
    tpu.vector_store %arg5[%c64, %c0_15], %13 {strides = array<i32>} : memref<144x384xbf16, #tpu.memory_space<vmem>>, vector<16x384xbf16>,
    %c0_16 = arith.constant 0 : index
    %c0_17 = arith.constant 0 : index
    %c20 = arith.constant 20 : index
    %15 = vector.load %arg2[%c0_16, %c0_17, %c20] : memref<1x16x512xbf16, #tpu.memory_space<vmem>>, vector<1x16x384xbf16>
    %16 = vector.shape_cast %15 : vector<1x16x384xbf16> to vector<16x384xbf16>
    %c80 = arith.constant 80 : index
    %c0_18 = arith.constant 0 : index
    %17 = vector.load %arg5[%c80, %c0_18] : memref<144x384xbf16, #tpu.memory_space<vmem>>, vector<16x384xbf16>
    tpu.vector_store %arg5[%c80, %c0_18], %16 {strides = array<i32>} : memref<144x384xbf16, #tpu.memory_space<vmem>>, vector<16x384xbf16>,
    %c0_19 = arith.constant 0 : index
    %c0_20 = arith.constant 0 : index
    %c36 = arith.constant 36 : index
    %18 = vector.load %arg2[%c0_19, %c0_20, %c36] : memref<1x16x512xbf16, #tpu.memory_space<vmem>>, vector<1x16x384xbf16>
    %19 = vector.shape_cast %18 : vector<1x16x384xbf16> to vector<16x384xbf16>
    %c96 = arith.constant 96 : index
    %c0_21 = arith.constant 0 : index
    %20 = vector.load %arg5[%c96, %c0_21] : memref<144x384xbf16, #tpu.memory_space<vmem>>, vector<16x384xbf16>
    tpu.vector_store %arg5[%c96, %c0_21], %19 {strides = array<i32>} : memref<144x384xbf16, #tpu.memory_space<vmem>>, vector<16x384xbf16>,
    %c0_22 = arith.constant 0 : index
    %c0_23 = arith.constant 0 : index
    %c37 = arith.constant 37 : index
    %21 = vector.load %arg2[%c0_22, %c0_23, %c37] : memref<1x16x512xbf16, #tpu.memory_space<vmem>>, vector<1x16x384xbf16>
    %22 = vector.shape_cast %21 : vector<1x16x384xbf16> to vector<16x384xbf16>
    %c112 = arith.constant 112 : index
    %c0_24 = arith.constant 0 : index
    %23 = vector.load %arg5[%c112, %c0_24] : memref<144x384xbf16, #tpu.memory_space<vmem>>, vector<16x384xbf16>
    tpu.vector_store %arg5[%c112, %c0_24], %22 {strides = array<i32>} : memref<144x384xbf16, #tpu.memory_space<vmem>>, vector<16x384xbf16>,
    %c0_25 = arith.constant 0 : index
    %c0_26 = arith.constant 0 : index
    %c38 = arith.constant 38 : index
    %24 = vector.load %arg2[%c0_25, %c0_26, %c38] : memref<1x16x512xbf16, #tpu.memory_space<vmem>>, vector<1x16x384xbf16>
    %25 = vector.shape_cast %24 : vector<1x16x384xbf16> to vector<16x384xbf16>
    %c128 = arith.constant 128 : index
    %c0_27 = arith.constant 0 : index
    %26 = vector.load %arg5[%c128, %c0_27] : memref<144x384xbf16, #tpu.memory_space<vmem>>, vector<16x384xbf16>
    tpu.vector_store %arg5[%c128, %c0_27], %25 {strides = array<i32>} : memref<144x384xbf16, #tpu.memory_space<vmem>>, vector<16x384xbf16>,
    %c0_28 = arith.constant 0 : index
    %c0_29 = arith.constant 0 : index
    %27 = vector.load %arg3[%c0_28, %c0_29] : memref<8x144xbf16, #tpu.memory_space<vmem>>, vector<8x144xbf16>
    %c0_30 = arith.constant 0 : index
    %c0_31 = arith.constant 0 : index
    %28 = vector.load %arg5[%c0_30, %c0_31] : memref<144x384xbf16, #tpu.memory_space<vmem>>, vector<144x384xbf16>
    %cst = arith.constant dense<0.000000e+00> : vector<8x384xf32>
    %29 = tpu.matmul %27, %28, %cst {dimension_numbers = #tpu.dot_dimension_numbers<[1], [0], [0], [1], [0, 0, 1, 1], [], []>} : vector<8x144xbf16>, vector<144x384xbf16>, vector<8x384xf32> -> vector<8x384xf32>
    %cst_32 = arith.constant 0.000000e+00 : f32
    %30 = vector.broadcast %cst_32 : f32 to vector<8x384xf32>
    %31 = arith.maximumf %29, %30 : vector<8x384xf32>
    %c0_33 = arith.constant 0 : index
    %c0_34 = arith.constant 0 : index
    %c0_35 = arith.constant 0 : index
    %32 = vector.load %arg4[%c0_33, %c0_34, %c0_35] : memref<1x8x384xf32, #tpu.memory_space<vmem>>, vector<1x8x384xf32>
    %33 = vector.shape_cast %32 : vector<1x8x384xf32> to vector<8x384xf32>
    %34 = vector.shape_cast %31 : vector<8x384xf32> to vector<1x8x384xf32>
    tpu.vector_store %arg4[%c0_33, %c0_34, %c0_35], %34 {strides = array<i32>} : memref<1x8x384xf32, #tpu.memory_space<vmem>>, vector<1x8x384xf32>,
    return
  }
  func.func @transform_0(%arg0: i32, %arg1: i32) -> (i32, i32, i32) {
    %c0_i32 = arith.constant 0 : i32
    %c0_i32_0 = arith.constant 0 : i32
    %c0_i32_1 = arith.constant 0 : i32
    return %arg0, %c0_i32, %c0_i32_0 : i32, i32, i32
  }
  func.func @transform_1(%arg0: i32, %arg1: i32) -> (i32, i32) {
    %c0_i32 = arith.constant 0 : i32
    %c0_i32_0 = arith.constant 0 : i32
    %c0_i32_1 = arith.constant 0 : i32
    return %c0_i32, %c0_i32_0 : i32, i32
  }
  func.func @transform_2(%arg0: i32, %arg1: i32) -> (i32, i32, i32) {
    %c0_i32 = arith.constant 0 : i32
    %c0_i32_0 = arith.constant 0 : i32
    return %arg0, %c0_i32, %arg1 : i32, i32, i32
  }
}

</mosaic_0001>

<bundles_post_ra>
// kernel: conv2d_block.1
= control target key start
LH: loop header
LB: loop body
LE: loop exit
PB: predicated region body
PF: predicated region fallthrough
CT: control target
= control target key end

     0   :  { %s842_s9 = smov 0   ;;  %s844_s10 = smov 0   ;;  %s897_s0 = inlined_call_operand.vmem [shape: bf16[2,16,512], index: 0, kind: input, shape index: {}]   ;;  %s898_s1 = inlined_call_operand.vmem [shape: bf16[8,144], index: 1, kind: input, shape index: {}]   ;;  %s899_s2 = inlined_call_operand.vmem [shape: f32[2,8,384], index: 2, kind: output, shape index: {}]  }
   0x1   :  { %s846_s11 = smov 0  }
   0x2 LB: > { %s24_s12 = sadd.s32 1, %s812_s10  ;;  %p705_p0 = scmp.ge.s32.totalorder %s816_s11, 1  ;;  %s816_s11 = sphi %s846_s11, %s12_s11   ;;  %s812_s10 = sphi %s844_s10, %s901_s10   ;;  %s808_s9 = sphi %s842_s9, %s900_s9  }
   0x3   : > { %p26_p1 = scmp.ge.s32.totalorder %s24_s12, 2  ;;  %p126_p2 = scmp.lt.s32.totalorder %s816_s11, 3 }
   0x5   : > { %s903_s12 = smov (%p26_p1, %s24_s12), 0  ;;  %p127_p3 = pnand %p705_p0, %p126_p2 }
   0x6   : > { %p152_p4 = scmp.lt.s32.totalorder (!%p127_p3), %s808_s9, 1  ;;  %v818_v0 = vmov (!%p127_p3), 0   ;;  %s819_s17 = smov (!%p127_p3), 127   ;;  %v871_v6 = vld [vmem:[%s898_s1] sm:$0xff] (!%p127_p3)  ;;  %vm529_vm0 = vcmask (!%p127_p3), 130048   ;;  %vm219_vm1 = vcmask (!%p127_p3), 1039360  }
   0x7   : > { %130 = sbr.rel (%p127_p3) target bundleno = 413 (0x19d), region = 28  ;;  %574 = vmatprep.subr.bf16.mxu1 (!%p127_p3), %v818_v0  ;;  %s820_s18 = smov (!%p127_p3), 126   ;;  %v745_v7 = vcombine.high (!%p127_p3), %v871_v6, %v871_v6  ;;  %vm257_vm2 = vcmask (!%p127_p3), 1031168   ;;  %vm295_vm3 = vcmask (!%p127_p3), 900096   ;;  %vm333_vm4 = vcmask (!%p127_p3), 891904  }
   0x8   : > { %s821_s19 = smov (!%p127_p3), 110   ;;  %s822_s20 = smov (!%p127_p3), 109   ;;  %vm371_vm5 = vcmask (!%p127_p3), 883712   ;;  %vm409_vm6 = vcmask (!%p127_p3), 752640   ;;  %vm447_vm7 = vcmask (!%p127_p3), 744448   ;;  %vm485_vm8 = vcmask (!%p127_p3), 736256  }
   0x9   : > { %s823_s21 = smov (!%p127_p3), 108   ;;  %s824_s22 = smov (!%p127_p3), 92   ;;  %746 = vmatprep.mubr.msk.bf16.mxu0 (!%p127_p3), %vm529_vm0, %v745_v7  ;;  %747 = vmatprep.mubr.msk.bf16.mxu1 (!%p127_p3), %vm529_vm0, %v745_v7  ;;  %v744_v63 = vcombine.low (!%p127_p3), %v871_v6, %v871_v6 }
   0xa   : > { %s825_s23 = smov (!%p127_p3), 91   ;;  %s826_s26 = smov (!%p127_p3), 90  }
   0xe   : > { %s905_s9 = smov (!%p152_p4, %s808_s9), 1 }
   0xf   : > { %s750_s13 = sshll.u32 %s905_s9, 5  ;;  %s751_s27 = smul.u32 24, %s905_s9 }
  0x10   : > { %s156_s16 = scalar_lea.vmem %s897_s0, %s750_s13 }
  0x11   : > { %v785_v1 = vld [vmem:[%s156_s16 + $0x4] ss:$16 sps:$4 sm:$0xff]   ;;  %v787_v2 = vld [vmem:[%s156_s16] ss:$16 sps:$4 sm:$0xff]   ;;  %v788_v3 = vld [vmem:[%s156_s16 + $0x8] ss:$16 sps:$4 sm:$0xff]   ;;  %s165_s30 = scalar_lea.vmem %s899_s2, %s751_s27 }
  0x12   : > { %213 = vrot.lane.b32.xlu0 %v785_v1, %s819_s17  ;;  %533 = vmatprep.subr.bf16.mxu0 %v785_v1  ;;  %v790_v4 = vld [vmem:[%s156_s16 + $0xc] ss:$16 sps:$4 sm:$0xff]   ;;  %v791_v5 = vld [vmem:[%s156_s16 + $0x8] ss:$16 sps:$4 sm:$0xff]  }
  0x13   : > { %211 = vrot.lane.b32.xlu1 %v787_v2, %s819_s17  ;;  %534 = vmatpush1.bf16.msra.mxu0 %v787_v2 }
  0x14   : > { %575 = vmatpush1.bf16.msra.mxu1 %v791_v5 }
  0x15   : > { %576 = vmatprep.subr.bf16.mxu1 %v818_v0 }
  0x16   : > { %215 = vrot.lane.b32.xlu0 %v788_v3, %s819_s17 }
  0x17   : > { %217 = vrot.lane.b32.xlu1 %v790_v4, %s819_s17 }
  0x1a   : > { %251 = vrot.lane.b32.xlu0 %v785_v1, %s820_s18 }
  0x1b   : > { %253 = vrot.lane.b32.xlu1 %v788_v3, %s820_s18 }
  0x1e   : > { %249 = vrot.lane.b32.xlu0 %v787_v2, %s820_s18 }
  0x1f   : > { %255 = vrot.lane.b32.xlu1 %v790_v4, %s820_s18 }
  0x22   : > { %289 = vrot.lane.b32.xlu0 %v785_v1, %s821_s19 }
  0x23   : > { %291 = vrot.lane.b32.xlu1 %v788_v3, %s821_s19 }
  0x26   : > { %287 = vrot.lane.b32.xlu0 %v787_v2, %s821_s19 }
  0x27   : > { %293 = vrot.lane.b32.xlu1 %v790_v4, %s821_s19 }
  0x2a   : > { %327 = vrot.lane.b32.xlu0 %v785_v1, %s822_s20 }
  0x2b   : > { %329 = vrot.lane.b32.xlu1 %v788_v3, %s822_s20 }
  0x2e   : > { %325 = vrot.lane.b32.xlu0 %v787_v2, %s822_s20 }
  0x2f   : > { %331 = vrot.lane.b32.xlu1 %v790_v4, %s822_s20 }
  0x32   : > { %365 = vrot.lane.b32.xlu0 %v785_v1, %s823_s21 }
  0x33   : > { %367 = vrot.lane.b32.xlu1 %v788_v3, %s823_s21 }
  0x36   : > { %363 = vrot.lane.b32.xlu0 %v787_v2, %s823_s21 }
  0x37   : > { %369 = vrot.lane.b32.xlu1 %v790_v4, %s823_s21 }
  0x3a   : > { %403 = vrot.lane.b32.xlu0 %v785_v1, %s824_s22 }
  0x3b   : > { %405 = vrot.lane.b32.xlu1 %v788_v3, %s824_s22 }
  0x3e   : > { %401 = vrot.lane.b32.xlu0 %v787_v2, %s824_s22 }
  0x3f   : > { %407 = vrot.lane.b32.xlu1 %v790_v4, %s824_s22 }
  0x42   : > { %441 = vrot.lane.b32.xlu0 %v785_v1, %s825_s23 }
  0x43   : > { %443 = vrot.lane.b32.xlu1 %v788_v3, %s825_s23 }
  0x46   : > { %439 = vrot.lane.b32.xlu0 %v787_v2, %s825_s23 }
  0x47   : > { %445 = vrot.lane.b32.xlu1 %v790_v4, %s825_s23 }
  0x4a   : > { %479 = vrot.lane.b32.xlu0 %v785_v1, %s826_s26 }
  0x4b   : > { %481 = vrot.lane.b32.xlu1 %v788_v3, %s826_s26 }
  0x4e   : > { %477 = vrot.lane.b32.xlu0 %v787_v2, %s826_s26 }
  0x4f   : > { %483 = vrot.lane.b32.xlu1 %v790_v4, %s826_s26 }
  0x84   : > { %v214_v8 = vpop.permute.xlu0 %213 }
  0x85   : > { %v212_v9 = vpop.permute.xlu1 %211 }
  0x86   : > { %v220_v14 = vsel %vm219_vm1, %v212_v9, %v214_v8 }
  0x88   : > { %v216_v10 = vpop.permute.xlu0 %215 }
  0x89   : > { %v218_v11 = vpop.permute.xlu1 %217  ;;  %v221_v12 = vsel %vm219_vm1, %v214_v8, %v216_v10 }
  0x8a   : > { %535 = vmatprep.subr.bf16.mxu0 %v221_v12  ;;  %v222_v13 = vsel %vm219_vm1, %v216_v10, %v218_v11 }
  0x8b   : > { %577 = vmatpush1.bf16.msra.mxu1 %v222_v13  ;;  %536 = vmatpush1.bf16.msra.mxu0 %v220_v14 }
  0x8c   : > { %v252_v15 = vpop.permute.xlu0 %251  ;;  %578 = vmatprep.subr.bf16.mxu1 %v818_v0 }
  0x8d   : > { %v254_v16 = vpop.permute.xlu1 %253 }
  0x8e   : > { %v259_v17 = vsel %vm257_vm2, %v252_v15, %v254_v16 }
  0x8f   : > { %537 = vmatprep.subr.bf16.mxu0 %v259_v17 }
  0x90   : > { %v250_v18 = vpop.permute.xlu0 %249 }
  0x91   : > { %v256_v19 = vpop.permute.xlu1 %255  ;;  %v258_v20 = vsel %vm257_vm2, %v250_v18, %v252_v15 }
  0x92   : > { %538 = vmatpush1.bf16.msra.mxu0 %v258_v20  ;;  %v260_v21 = vsel %vm257_vm2, %v254_v16, %v256_v19 }
  0x93   : > { %579 = vmatpush1.bf16.msra.mxu1 %v260_v21 }
  0x94   : > { %v290_v22 = vpop.permute.xlu0 %289  ;;  %580 = vmatprep.subr.bf16.mxu1 %v818_v0 }
  0x95   : > { %v292_v23 = vpop.permute.xlu1 %291 }
  0x96   : > { %v297_v24 = vsel %vm295_vm3, %v290_v22, %v292_v23 }
  0x97   : > { %539 = vmatprep.subr.bf16.mxu0 %v297_v24 }
  0x98   : > { %v288_v25 = vpop.permute.xlu0 %287 }
  0x99   : > { %v294_v26 = vpop.permute.xlu1 %293  ;;  %v296_v27 = vsel %vm295_vm3, %v288_v25, %v290_v22 }
  0x9a   : > { %540 = vmatpush1.bf16.msra.mxu0 %v296_v27  ;;  %v298_v28 = vsel %vm295_vm3, %v292_v23, %v294_v26 }
  0x9b   : > { %581 = vmatpush1.bf16.msra.mxu1 %v298_v28 }
  0x9c   : > { %v328_v29 = vpop.permute.xlu0 %327  ;;  %582 = vmatprep.subr.bf16.mxu1 %v818_v0 }
  0x9d   : > { %v330_v30 = vpop.permute.xlu1 %329 }
  0x9e   : > { %v335_v31 = vsel %vm333_vm4, %v328_v29, %v330_v30 }
  0x9f   : > { %541 = vmatprep.subr.bf16.mxu0 %v335_v31 }
  0xa0   : > { %v326_v32 = vpop.permute.xlu0 %325 }
  0xa1   : > { %v332_v33 = vpop.permute.xlu1 %331  ;;  %v334_v34 = vsel %vm333_vm4, %v326_v32, %v328_v29 }
  0xa2   : > { %542 = vmatpush1.bf16.msra.mxu0 %v334_v34  ;;  %v336_v35 = vsel %vm333_vm4, %v330_v30, %v332_v33 }
  0xa3   : > { %583 = vmatpush1.bf16.msra.mxu1 %v336_v35 }
  0xa4   : > { %v366_v36 = vpop.permute.xlu0 %365  ;;  %584 = vmatprep.subr.bf16.mxu1 %v818_v0 }
  0xa5   : > { %v368_v37 = vpop.permute.xlu1 %367 }
  0xa6   : > { %v373_v38 = vsel %vm371_vm5, %v366_v36, %v368_v37 }
  0xa7   : > { %543 = vmatprep.subr.bf16.mxu0 %v373_v38 }
  0xa8   : > { %v364_v39 = vpop.permute.xlu0 %363 }
  0xa9   : > { %v370_v40 = vpop.permute.xlu1 %369  ;;  %v372_v41 = vsel %vm371_vm5, %v364_v39, %v366_v36 }
  0xaa   : > { %544 = vmatpush1.bf16.msra.mxu0 %v372_v41  ;;  %v374_v42 = vsel %vm371_vm5, %v368_v37, %v370_v40 }
  0xab   : > { %585 = vmatpush1.bf16.msra.mxu1 %v374_v42 }
  0xac   : > { %v404_v43 = vpop.permute.xlu0 %403  ;;  %586 = vmatprep.subr.bf16.mxu1 %v818_v0 }
  0xad   : > { %v406_v44 = vpop.permute.xlu1 %405 }
  0xae   : > { %v411_v45 = vsel %vm409_vm6, %v404_v43, %v406_v44 }
  0xaf   : > { %545 = vmatprep.subr.bf16.mxu0 %v411_v45 }
  0xb0   : > { %v402_v46 = vpop.permute.xlu0 %401 }
  0xb1   : > { %v408_v47 = vpop.permute.xlu1 %407  ;;  %v410_v48 = vsel %vm409_vm6, %v402_v46, %v404_v43 }
  0xb2   : > { %546 = vmatpush1.bf16.msra.mxu0 %v410_v48  ;;  %v412_v49 = vsel %vm409_vm6, %v406_v44, %v408_v47 }
  0xb3   : > { %587 = vmatpush1.bf16.msra.mxu1 %v412_v49 }
  0xb4   : > { %v442_v50 = vpop.permute.xlu0 %441  ;;  %588 = vmatprep.subr.bf16.mxu1 %v818_v0 }
  0xb5   : > { %v444_v51 = vpop.permute.xlu1 %443 }
  0xb6   : > { %v449_v52 = vsel %vm447_vm7, %v442_v50, %v444_v51 }
  0xb7   : > { %547 = vmatprep.subr.bf16.mxu0 %v449_v52 }
  0xb8   : > { %v440_v53 = vpop.permute.xlu0 %439 }
  0xb9   : > { %v446_v54 = vpop.permute.xlu1 %445  ;;  %v448_v55 = vsel %vm447_vm7, %v440_v53, %v442_v50 }
  0xba   : > { %548 = vmatpush1.bf16.msra.mxu0 %v448_v55  ;;  %v450_v56 = vsel %vm447_vm7, %v444_v51, %v446_v54 }
  0xbb   : > { %589 = vmatpush1.bf16.msra.mxu1 %v450_v56 }
  0xbc   : > { %v480_v57 = vpop.permute.xlu0 %479  ;;  %590 = vmatprep.subr.bf16.mxu1 %v818_v0 }
  0xbd   : > { %v482_v58 = vpop.permute.xlu1 %481 }
  0xbe   : > { %v487_v59 = vsel %vm485_vm8, %v480_v57, %v482_v58 }
  0xbf   : > { %549 = vmatprep.subr.bf16.mxu0 %v487_v59 }
  0xc0   : > { %v478_v60 = vpop.permute.xlu0 %477 }
  0xc1   : > { %v484_v61 = vpop.permute.xlu1 %483  ;;  %v486_v62 = vsel %vm485_vm8, %v478_v60, %v480_v57 }
  0xc2   : > { %550 = vmatpush1.bf16.msra.mxu0 %v486_v62  ;;  %v488_v1 = vsel %vm485_vm8, %v482_v58, %v484_v61 }
  0xc3   : > { %591 = vmatpush1.bf16.msra.mxu1 %v488_v1 }
  0xc5   : > { %566 = vmatmul.mubr.bf16.vlgmr.msra.gmra.mrb[0].mxu0 %v744_v63 }
  0xc6   : > { %607 = vmatmul.mubr.bf16.vlgmr.msra.gmra.mrb[0].mxu1 %v744_v63 }
 0x198   : > { %v567_v0 = vpop.f32.mrb[0].mxu0 }
 0x199   : > { %v614_v2 = vmax.f32 %v567_v0, 0.0  ;;  %v608_v3 = vpop.f32.mrb[0].mxu1  ;;  %v569_v4 = vpop.f32.mrb[1].mxu0 }
 0x19a   : > { %v616_v5 = vmax.f32 %v608_v3, 0.0  ;;  %v615_v7 = vmax.f32 %v569_v4, 0.0  ;;  %v610_v8 = vpop.f32.mrb[1].mxu1  ;;  %v571_v9 = vpop.f32.mrb[2].mxu0 }
 0x19b   : > { %617 = vst [vmem:[%s165_s30] sm:$0xff] %v614_v2  ;;  %v611_v6 = vpop.f32.mrb[2].mxu1  ;;  %v572_v10 = vpop.f32.mrb[3].mxu0 }
 0x19c   : > { %619 = vst [vmem:[%s165_s30 + $0x10] sm:$0xff] %v616_v5  ;;  %618 = vst [vmem:[%s165_s30 + $0x8] sm:$0xff] %v615_v7  ;;  %v612_v11 = vpop.f32.mrb[3].mxu1 }
 0x19d PF: > { %s12_s11 = sadd.s32 1, %s816_s11   ;;  %s900_s9 = smov %s812_s10 }
 0x19e   : > { %p9_p5 = scmp.ge.s32.totalorder %s12_s11, 4   ;;  %s901_s10 = smov %s903_s12 }
 0x1a0   :  { %11 = sbr.rel (!%p9_p5) target bundleno = 2 (0x2), region = 58 }

</bundles_post_ra>
